<compile_context>
chip_gen: v7x
topology: tpu7x:2x2x1
jax: 0.10.0
libtpu: 0.0.40
codegen_flags: <defaults>
</compile_context>

<pallas_src>
import jax
import jax.numpy as jnp
from jax.experimental import pallas as pl
from jax.experimental.pallas import tpu as pltpu

IN_DIM = 20
HIDDEN = 200
HIDDEN_PAD = 256   # 2 x 128 lanes


def _round_up(n, m):
    return ((n + m - 1) // m) * m


def _choose_tiling(B):
    """Return (tile_b, n_tiles)."""
    b16 = _round_up(B, 16)          # bf16 sublane-packing friendly
    if b16 <= 512:
        return b16, 1               # one grid step; overhead-bound regime anyway
    # Large batches: big tiles (cap 2048 for v7x VMEM headroom), at least two
    # grid steps so dimension_semantics=("parallel",) can use both v7x TCs.
    n_tiles = max(2, -(-b16 // 2048))
    tile_b = _round_up(-(-b16 // n_tiles), 256)   # multiple of 256 -> lane-dense out
    return tile_b, n_tiles


def _ebm_kernel(z_ref, w1_ref, b1_ref, w2_ref, b2_ref, w3_ref, b3_ref, o_ref):
    # z tile: (TILE_B, 20) bf16 (cast once in the wrapper).
    z = z_ref[...]

    # Layer 1: (TILE_B, 20) @ (20, 256) -> f32 accumulate, f32 epilogue.
    h1 = jnp.dot(z, w1_ref[...], preferred_element_type=jnp.float32)
    h1 = h1 + b1_ref[...]
    h1 = jnp.maximum(h1, 0.2 * h1)                       # LeakyReLU(0.2)

    # Layer 2: (TILE_B, 256) @ (256, 256), bf16 operands, f32 accumulate.
    h2 = jnp.dot(h1.astype(jnp.bfloat16), w2_ref[...],
                 preferred_element_type=jnp.float32)
    h2 = h2 + b2_ref[...]
    h2 = jnp.maximum(h2, 0.2 * h2)                       # LeakyReLU(0.2)

    # Layer 3 (out dim 1): VPU multiply + XLU lane reduction instead of an
    # N=1 MXU matmul.  w3_ref is the (1, 256) f32 row of the padded weight,
    # b3_ref is a (1, 1) scalar in SMEM.  Result is written lane-dense:
    # batch index lives on the lane axis of the (1, 1, TILE_B) output block.
    e = jnp.sum(h2 * w3_ref[...], axis=-1) + b3_ref[0, 0]    # (TILE_B,)
    o_ref[...] = e[None, None, :].astype(o_ref.dtype)        # (1, 1, TILE_B)


def prepare_params(params):
    """Pad hidden dim 200->256 (exact) and cast MXU weights to bf16."""
    w1, b1, w2, b2, w3, b3 = params
    pad = HIDDEN_PAD - HIDDEN
    w1p = jnp.pad(w1, ((0, 0), (0, pad))).astype(jnp.bfloat16)    # (20, 256)
    b1p = jnp.pad(b1, ((0, 0), (0, pad)))                         # (1, 256) f32
    w2p = jnp.pad(w2, ((0, pad), (0, pad))).astype(jnp.bfloat16)  # (256, 256)
    b2p = jnp.pad(b2, ((0, 0), (0, pad)))                         # (1, 256) f32
    w3p = jnp.pad(w3.T, ((0, 0), (0, pad)))                       # (1, 256) f32 row
    return (w1p, b1p, w2p, b2p, w3p, b3)                          # b3: (1, 1) f32


def netE_forward(z, prepared_params):
    """z: (B, 20, 1, 1) or (B, 20).  Returns (B, 1, 1, 1) float32."""
    w1, b1, w2, b2, w3, b3 = prepared_params
    B = z.shape[0]
    # Known-shape reshape (robust for B == 1, unlike torch-style squeeze);
    # z streamed as bf16 (it feeds a bf16 MXU matmul anyway).
    z2d = jnp.reshape(z, (B, IN_DIM)).astype(jnp.bfloat16)

    tile_b, n_tiles = _choose_tiling(B)
    b_pad = tile_b * n_tiles
    if b_pad != B:
        z2d = jnp.pad(z2d, ((0, b_pad - B), (0, 0)))

    flops = 2 * b_pad * (IN_DIM * HIDDEN_PAD + HIDDEN_PAD * HIDDEN_PAD + HIDDEN_PAD)
    bytes_accessed = (int(z2d.size) * z2d.dtype.itemsize + b_pad * 4 +
                      sum(int(p.size) * p.dtype.itemsize
                          for p in (w1, b1, w2, b2, w3, b3)))
    cost = pl.CostEstimate(flops=flops, transcendentals=0,
                           bytes_accessed=bytes_accessed)

    const = lambda i: (0, 0)
    out = pl.pallas_call(
        _ebm_kernel,
        out_shape=jax.ShapeDtypeStruct((n_tiles, 1, tile_b), jnp.float32),
        grid=(n_tiles,),
        in_specs=[
            pl.BlockSpec((tile_b, IN_DIM), lambda i: (i, 0)),       # z tile (bf16)
            pl.BlockSpec((IN_DIM, HIDDEN_PAD), const),              # w1 (resident)
            pl.BlockSpec((1, HIDDEN_PAD), const),                   # b1
            pl.BlockSpec((HIDDEN_PAD, HIDDEN_PAD), const),          # w2
            pl.BlockSpec((1, HIDDEN_PAD), const),                   # b2
            pl.BlockSpec((1, HIDDEN_PAD), const),                   # w3 row
            pl.BlockSpec(memory_space=pltpu.MemorySpace.SMEM),      # b3 scalar
        ],
        out_specs=pl.BlockSpec((1, 1, tile_b), lambda i: (i, 0, 0)),  # lane-dense
        compiler_params=pltpu.CompilerParams(
            dimension_semantics=("parallel",)),
        cost_estimate=cost,
    )(z2d, w1, b1, w2, b2, w3, b3)

    # (n_tiles, 1, tile_b) -> flat batch order -> (B, 1, 1, 1)   [.view(-1,1,1,1)]
    return out.reshape(-1)[:B].reshape(B, 1, 1, 1)


def init_params(key):
    """Deterministic init mimicking torch.nn.Linear default U(-1/sqrt(fan_in), +)."""
    def linear(key, fan_in, fan_out):
        kw, kb = jax.random.split(key)
        bound = 1.0 / jnp.sqrt(fan_in)
        # stored as (in, out) so the kernel computes x @ W
        w = jax.random.uniform(kw, (fan_in, fan_out), jnp.float32, -bound, bound)
        b = jax.random.uniform(kb, (1, fan_out), jnp.float32, -bound, bound)
        return w, b

    k1, k2, k3 = jax.random.split(key, 3)
    w1, b1 = linear(k1, IN_DIM, HIDDEN)
    w2, b2 = linear(k2, HIDDEN, HIDDEN)
    w3, b3 = linear(k3, HIDDEN, 1)
    return (w1, b1, w2, b2, w3, b3)


def _reference(z, params):
    """Pure-JAX reference mirroring the kernel's bf16-operand / f32-accumulate math."""
    w1, b1, w2, b2, w3, b3 = params
    x = jnp.reshape(z, (-1, IN_DIM)).astype(jnp.float32)
    h = jnp.dot(x.astype(jnp.bfloat16), w1.astype(jnp.bfloat16),
                preferred_element_type=jnp.float32) + b1
    h = jnp.maximum(h, 0.2 * h)
    h = jnp.dot(h.astype(jnp.bfloat16), w2.astype(jnp.bfloat16),
                preferred_element_type=jnp.float32) + b2
    h = jnp.maximum(h, 0.2 * h)
    o = h @ w3 + b3
    return o.reshape(-1, 1, 1, 1)


if __name__ == "__main__":
    key = jax.random.PRNGKey(0)
    kz, kp = jax.random.split(key)

    params = init_params(kp)
    prepared = prepare_params(params)

    # Primary small test (B=8), plus B=1 (squeeze robustness) and one
    # multi-tile batch exercising the lane-dense, >=2-grid-step path.
    for B in (8, 1, 1040):
        z = jax.random.normal(jax.random.fold_in(kz, B),
                              (B, IN_DIM, 1, 1), jnp.float32)
        out = jax.block_until_ready(netE_forward(z, prepared))
        ref = _reference(z, params)
        assert out.shape == (B, 1, 1, 1), out.shape
        assert jnp.allclose(out, ref, atol=2e-3, rtol=2e-3), f"mismatch at B={B}"

    print("KERNEL_OK")
</pallas_src>

<mosaic_0001>
module attributes {stable_mosaic.version = 11 : i64} {
  func.func @_ebm_kernel(%arg0: i32, %arg1: memref<16x20xbf16, #tpu.memory_space<vmem>>, %arg2: memref<20x256xbf16, #tpu.memory_space<vmem>>, %arg3: memref<1x256xf32, #tpu.memory_space<vmem>>, %arg4: memref<256x256xbf16, #tpu.memory_space<vmem>>, %arg5: memref<1x256xf32, #tpu.memory_space<vmem>>, %arg6: memref<1x256xf32, #tpu.memory_space<vmem>>, %arg7: memref<1x1xf32, #tpu.memory_space<smem>>, %arg8: memref<1x1x16xf32, #tpu.memory_space<vmem>>) attributes {dimension_semantics = [#tpu.dimension_semantics<parallel>], iteration_bounds = array<i64: 1>, scalar_prefetch = 0 : i64, scratch_operands = 0 : i64, tpu.core_type = #tpu.core_type<tc>, window_params = [{transform_indices = @transform_0, window_bounds = array<i64: 16, 20>}, {pipeline_mode = #tpu.pipeline_mode<synchronous>, transform_indices = @transform_1, window_bounds = array<i64: 20, 256>}, {pipeline_mode = #tpu.pipeline_mode<synchronous>, transform_indices = @transform_2, window_bounds = array<i64: 1, 256>}, {pipeline_mode = #tpu.pipeline_mode<synchronous>, transform_indices = @transform_3, window_bounds = array<i64: 256, 256>}, {pipeline_mode = #tpu.pipeline_mode<synchronous>, transform_indices = @transform_4, window_bounds = array<i64: 1, 256>}, {pipeline_mode = #tpu.pipeline_mode<synchronous>, transform_indices = @transform_5, window_bounds = array<i64: 1, 256>}, {transform_indices = @transform_6, window_bounds = array<i64: 1, 1>}, {transform_indices = @transform_7, window_bounds = array<i64: 1, 1, 16>}]} {
    %c0 = arith.constant 0 : index
    %c0_0 = arith.constant 0 : index
    %0 = vector.load %arg1[%c0, %c0_0] : memref<16x20xbf16, #tpu.memory_space<vmem>>, vector<16x20xbf16>
    %c0_1 = arith.constant 0 : index
    %c0_2 = arith.constant 0 : index
    %1 = vector.load %arg2[%c0_1, %c0_2] : memref<20x256xbf16, #tpu.memory_space<vmem>>, vector<20x256xbf16>
    %cst = arith.constant dense<0.000000e+00> : vector<16x256xf32>
    %2 = tpu.matmul %0, %1, %cst {dimension_numbers = #tpu.dot_dimension_numbers<[1], [0], [0], [1], [0, 0, 1, 1], [], []>} : vector<16x20xbf16>, vector<20x256xbf16>, vector<16x256xf32> -> vector<16x256xf32>
    %c0_3 = arith.constant 0 : index
    %c0_4 = arith.constant 0 : index
    %3 = vector.load %arg3[%c0_3, %c0_4] : memref<1x256xf32, #tpu.memory_space<vmem>>, vector<1x256xf32>
    %4 = vector.broadcast %3 : vector<1x256xf32> to vector<16x256xf32>
    %5 = arith.addf %2, %4 : vector<16x256xf32>
    %cst_5 = arith.constant 2.000000e-01 : f32
    %6 = vector.broadcast %cst_5 : f32 to vector<16x256xf32>
    %7 = arith.mulf %6, %5 : vector<16x256xf32>
    %8 = arith.maximumf %5, %7 : vector<16x256xf32>
    %9 = arith.truncf %8 : vector<16x256xf32> to vector<16x256xbf16>
    %c0_6 = arith.constant 0 : index
    %c0_7 = arith.constant 0 : index
    %10 = vector.load %arg4[%c0_6, %c0_7] : memref<256x256xbf16, #tpu.memory_space<vmem>>, vector<256x256xbf16>
    %cst_8 = arith.constant dense<0.000000e+00> : vector<16x256xf32>
    %11 = tpu.matmul %9, %10, %cst_8 {dimension_numbers = #tpu.dot_dimension_numbers<[1], [0], [0], [1], [0, 0, 1, 1], [], []>} : vector<16x256xbf16>, vector<256x256xbf16>, vector<16x256xf32> -> vector<16x256xf32>
    %c0_9 = arith.constant 0 : index
    %c0_10 = arith.constant 0 : index
    %12 = vector.load %arg5[%c0_9, %c0_10] : memref<1x256xf32, #tpu.memory_space<vmem>>, vector<1x256xf32>
    %13 = vector.broadcast %12 : vector<1x256xf32> to vector<16x256xf32>
    %14 = arith.addf %11, %13 : vector<16x256xf32>
    %cst_11 = arith.constant 2.000000e-01 : f32
    %15 = vector.broadcast %cst_11 : f32 to vector<16x256xf32>
    %16 = arith.mulf %15, %14 : vector<16x256xf32>
    %17 = arith.maximumf %14, %16 : vector<16x256xf32>
    %c0_12 = arith.constant 0 : index
    %c0_13 = arith.constant 0 : index
    %18 = vector.load %arg6[%c0_12, %c0_13] : memref<1x256xf32, #tpu.memory_space<vmem>>, vector<1x256xf32>
    %19 = vector.broadcast %18 : vector<1x256xf32> to vector<16x256xf32>
    %20 = arith.mulf %17, %19 : vector<16x256xf32>
    %cst_14 = arith.constant dense<0.000000e+00> : vector<16xf32>
    %21 = vector.multi_reduction <add>, %20, %cst_14 [1] : vector<16x256xf32> to vector<16xf32>
    %c0_15 = arith.constant 0 : index
    %c0_16 = arith.constant 0 : index
    %22 = memref.load %arg7[%c0_15, %c0_16] : memref<1x1xf32, #tpu.memory_space<smem>>
    %23 = vector.broadcast %22 : f32 to vector<16xf32>
    %24 = arith.addf %21, %23 : vector<16xf32>
    %25 = vector.shape_cast %24 : vector<16xf32> to vector<1x1x16xf32>
    %c0_17 = arith.constant 0 : index
    %c0_18 = arith.constant 0 : index
    %c0_19 = arith.constant 0 : index
    %26 = vector.load %arg8[%c0_17, %c0_18, %c0_19] : memref<1x1x16xf32, #tpu.memory_space<vmem>>, vector<1x1x16xf32>
    tpu.vector_store %arg8[%c0_17, %c0_18, %c0_19], %25 {strides = array<i32>} : memref<1x1x16xf32, #tpu.memory_space<vmem>>, vector<1x1x16xf32>,
    return
  }
  func.func @transform_0(%arg0: i32) -> (i32, i32) {
    %c0_i32 = arith.constant 0 : i32
    %c0_i32_0 = arith.constant 0 : i32
    return %arg0, %c0_i32 : i32, i32
  }
  func.func @transform_1(%arg0: i32) -> (i32, i32) {
    %c0_i32 = arith.constant 0 : i32
    %c0_i32_0 = arith.constant 0 : i32
    %c0_i32_1 = arith.constant 0 : i32
    return %c0_i32, %c0_i32_0 : i32, i32
  }
  func.func @transform_2(%arg0: i32) -> (i32, i32) {
    %c0_i32 = arith.constant 0 : i32
    %c0_i32_0 = arith.constant 0 : i32
    %c0_i32_1 = arith.constant 0 : i32
    return %c0_i32, %c0_i32_0 : i32, i32
  }
  func.func @transform_3(%arg0: i32) -> (i32, i32) {
    %c0_i32 = arith.constant 0 : i32
    %c0_i32_0 = arith.constant 0 : i32
    %c0_i32_1 = arith.constant 0 : i32
    return %c0_i32, %c0_i32_0 : i32, i32
  }
  func.func @transform_4(%arg0: i32) -> (i32, i32) {
    %c0_i32 = arith.constant 0 : i32
    %c0_i32_0 = arith.constant 0 : i32
    %c0_i32_1 = arith.constant 0 : i32
    return %c0_i32, %c0_i32_0 : i32, i32
  }
  func.func @transform_5(%arg0: i32) -> (i32, i32) {
    %c0_i32 = arith.constant 0 : i32
    %c0_i32_0 = arith.constant 0 : i32
    %c0_i32_1 = arith.constant 0 : i32
    return %c0_i32, %c0_i32_0 : i32, i32
  }
  func.func @transform_6(%arg0: i32) -> (i32, i32) {
    %c0_i32 = arith.constant 0 : i32
    %c0_i32_0 = arith.constant 0 : i32
    %c0_i32_1 = arith.constant 0 : i32
    return %c0_i32, %c0_i32_0 : i32, i32
  }
  func.func @transform_7(%arg0: i32) -> (i32, i32, i32) {
    %c0_i32 = arith.constant 0 : i32
    %c0_i32_0 = arith.constant 0 : i32
    %c0_i32_1 = arith.constant 0 : i32
    return %arg0, %c0_i32, %c0_i32_0 : i32, i32, i32
  }
}

</mosaic_0001>

<bundles_post_ra>
// kernel: tpu_custom_call.1
= control target key start
LH: loop header
LB: loop body
LE: loop exit
PB: predicated region body
PF: predicated region fallthrough
CT: control target
= control target key end

     0   :  { %13 = vsyncpa [#allocation4], 0  ;;  %s803_s0 = inlined_call_operand.hbm [shape: bf16[16,20], index: 0, kind: input, shape index: {}]   ;;  %s804_s1 = inlined_call_operand.hbm [shape: bf16[20,256], index: 1, kind: input, shape index: {}]   ;;  %s805_s2 = inlined_call_operand.vmem [shape: f32[1,256], index: 2, kind: input, shape index: {}]   ;;  %s806_s3 = inlined_call_operand.hbm [shape: bf16[256,256], index: 3, kind: input, shape index: {}]   ;;  %s807_s4 = inlined_call_operand.vmem [shape: f32[1,256], index: 4, kind: input, shape index: {}]   ;;  %s808_s5 = inlined_call_operand.vmem [shape: f32[1,256], index: 5, kind: input, shape index: {}]   ;;  %s809_s6 = inlined_call_operand.<no memory space> [shape: f32[1,1], index: 6, kind: input, shape index: {}]   ;;  %s810_s7 = inlined_call_operand.hbm [shape: f32[1,1,16], index: 7, kind: output, shape index: {}]  }
   0x1   :  { %14 = vsyncpa [#allocation7], 0 }
   0x2   :  { %15 = vsyncpa [#allocation5], 0  ;;  %s682_s24 = smov [#allocation6]   ;;  %s588_s28 = scalar_lea.hbm %s804_s1, 384 }
   0x3   :  { %s33_s25 = sshll.u32 %s682_s24, 4  ;;  %p589_p0 = scmp.ne.s32.totalorder %s804_s1, %s588_s28  ;;  %s34_s25 = int_to_ptr.vmem [resolvable:$true] %s33_s25 }
   0x4   :  { %p592_p1 = scmp.lt.u32.totalorder %s588_s28, %s804_s1 }
   0x6   :  { %p594_p2 = pnand %p592_p1, %p589_p0 }
   0x8   :  { %597 = shalt.err (!%p594_p2)
}
   0x9   :  { %s598_s10 = scalar_lea.vmem %s34_s25, 384  ;;  %p603_p4 = scmp.lt.s32.totalorder %s34_s25, %s34_s25 }
   0xa   :  { %p599_p3 = scmp.ne.s32.totalorder %s34_s25, %s598_s10  ;;  %p604_p5 = scmp.lt.s32.totalorder %s598_s10, %s598_s10 }
   0xc   :  { %p605_p6 = por %p604_p5, %p603_p4 }
   0xe   :  { %p606_p7 = pnand %p605_p6, %p599_p3 }
  0x10   :  { %609 = shalt.err (!%p606_p7)
}
  0x11   :  { %s683_s11 = smov 128   ;;  %s684_s12 = smov 8  }
  0x12   :  { %39 = dma.hbm_to_vmem [thread:$0]  %s804_s1, 384, %s34_s25, [#allocation7], %s683_s11, %s683_s11, %s684_s12  }
  0x13   :  { %s685_s15 = smov [#allocation3]   ;;  %s610_s19 = scalar_lea.hbm %s803_s0, 128 }
  0x14   :  { %s21_s16 = sshll.u32 %s685_s15, 4  ;;  %p611_p8 = scmp.ne.s32.totalorder %s803_s0, %s610_s19  ;;  %s22_s16 = int_to_ptr.vmem [resolvable:$true] %s21_s16 }
  0x15   :  { %p614_p9 = scmp.lt.u32.totalorder %s610_s19, %s803_s0 }
  0x17   :  { %p616_p10 = pnand %p614_p9, %p611_p8 }
  0x19   :  { %619 = shalt.err (!%p616_p10)
}
  0x1a   :  { %s620_s24 = scalar_lea.vmem %s22_s16, 128  ;;  %p625_p12 = scmp.lt.s32.totalorder %s22_s16, %s22_s16 }
  0x1b   :  { %p621_p11 = scmp.ne.s32.totalorder %s22_s16, %s620_s24  ;;  %p626_p13 = scmp.lt.s32.totalorder %s620_s24, %s620_s24 }
  0x1d   :  { %p627_p0 = por %p626_p13, %p625_p12 }
  0x1f   :  { %p628_p1 = pnand %p627_p0, %p621_p11 }
  0x21   :  { %631 = shalt.err (!%p628_p1)
}
  0x22   :  { %s686_s1 = smov 64   ;;  %s687_s25 = smov 4  }
  0x23   :  { %27 = dma.hbm_to_vmem [thread:$0]  %s803_s0, 128, %s22_s16, [#allocation4], %s686_s1, %s686_s1, %s687_s25  }
  0x24   :  { %s688_s28 = smov [#allocation8]   ;;  %s632_s9 = scalar_lea.hbm %s806_s3, 4096 }
  0x25   :  { %s47_s29 = sshll.u32 %s688_s28, 4  ;;  %p633_p2 = scmp.ne.s32.totalorder %s806_s3, %s632_s9  ;;  %s48_s29 = int_to_ptr.vmem [resolvable:$true] %s47_s29 }
  0x26   :  { %p636_p3 = scmp.lt.u32.totalorder %s632_s9, %s806_s3 }
  0x28   :  { %p638_p4 = pnand %p636_p3, %p633_p2 }
  0x2a   :  { %641 = shalt.err (!%p638_p4)
}
  0x2b   :  { %s642_s17 = scalar_lea.vmem %s48_s29, 4096  ;;  %p647_p6 = scmp.lt.s32.totalorder %s48_s29, %s48_s29 }
  0x2c   :  { %p643_p5 = scmp.ne.s32.totalorder %s48_s29, %s642_s17  ;;  %p648_p7 = scmp.lt.s32.totalorder %s642_s17, %s642_s17 }
  0x2e   :  { %p649_p8 = por %p648_p7, %p647_p6 }
  0x30   :  { %p650_p9 = pnand %p649_p8, %p643_p5 }
  0x32   :  { %653 = shalt.err (!%p650_p9)
}
  0x33   :  { %53 = dma.hbm_to_vmem [thread:$0]  %s806_s3, 4096, %s48_s29, [#allocation7], %s683_s11, %s683_s11, %s684_s12  }
  0x34   :  { %676 = dma.done.wait [#allocation4], 128  }
  0x35   :  { %677 = vsyncadd [#allocation4], 4294967168 }
  0x36   :  { %678 = dma.done.wait [#allocation7], 4480  }
  0x37   :  { %679 = vsyncadd [#allocation7], 4294962816  ;;  %v689_v0 = vmov 0   ;;  %v534_v1 = vld [vmem:[#allocation6 + $0x4] ss:$8 sps:$4 sm:$0xff]   ;;  %vm111_vm0 = vcmask 1041408   ;;  %v77_v40 = vlaneseq }
  0x38   :  { %150 = vmatprep.mubr.bf16.mxu0 %v689_v0  ;;  %v536_v2 = vld [vmem:[#allocation6] ss:$8 sps:$4 sm:$0xff]   ;;  %v74_v3 = vld [vmem:[#allocation6 + $0x10] sm:$0x33]  ;;  %118 = vmatprep.subr.bf16.mxu0 %v534_v1  ;;  %v540_v6 = vld [vmem:[#allocation8 + $0x4] ss:$8 sps:$4 sm:$0xff]  }
  0x39   :  { %v490_v4 = vcombine.high %v74_v3, %v74_v3  ;;  %v489_v5 = vcombine.low %v74_v3, %v74_v3  ;;  %119 = vmatpush1.bf16.msra.mxu0 %v536_v2  ;;  %v542_v7 = vld [vmem:[#allocation8] ss:$8 sps:$4 sm:$0xff]   ;;  %v543_v9 = vld [vmem:[#allocation8 + $0x14] ss:$8 sps:$4 sm:$0xff]   ;;  %375 = vmatprep.subr.bf16.mxu1 %v540_v6  ;;  %v545_v11 = vld [vmem:[#allocation8 + $0x10] ss:$8 sps:$4 sm:$0xff]  }
  0x3a   :  { %v539_v10 = vld [vmem:[#allocation3] sm:$0xff]   ;;  %376 = vmatpush1.bf16.msra.mxu1 %v542_v7  ;;  %vm107_vm1 = vcmask 162816   ;;  %v549_v14 = vld [vmem:[#allocation8 + $0x34] ss:$8 sps:$4 sm:$0xff]   ;;  %v551_v15 = vld [vmem:[#allocation8 + $0x30] ss:$8 sps:$4 sm:$0xff]  }
  0x3b   :  { %491 = vmatprep.subr.msk.bf16.mxu0 %vm111_vm0, %v490_v4  ;;  %v113_v8 = vsel %vm111_vm0, %v489_v5, 0  ;;  %377 = vmatprep.subr.bf16.mxu1 %v543_v9  ;;  %v546_v12 = vld [vmem:[#allocation8 + $0x24] ss:$8 sps:$4 sm:$0xff]   ;;  %v548_v13 = vld [vmem:[#allocation8 + $0x20] ss:$8 sps:$4 sm:$0xff]   ;;  %v773_v41 = vshrl.u32 %v77_v40, 7 }
  0x3c   :  { %v552_v16 = vld [vmem:[#allocation8 + $0x44] ss:$8 sps:$4 sm:$0xff]   ;;  %v554_v17 = vld [vmem:[#allocation8 + $0x40] ss:$8 sps:$4 sm:$0xff]   ;;  %v555_v18 = vld [vmem:[#allocation8 + $0x54] ss:$8 sps:$4 sm:$0xff]  }
  0x3d   :  { %121 = vmatpush1.bf16.msra.mxu0 %v113_v8  ;;  %v557_v19 = vld [vmem:[#allocation8 + $0x50] ss:$8 sps:$4 sm:$0xff]   ;;  %v558_v20 = vld [vmem:[#allocation8 + $0x64] ss:$8 sps:$4 sm:$0xff]   ;;  %v560_v21 = vld [vmem:[#allocation8 + $0x60] ss:$8 sps:$4 sm:$0xff]  }
  0x3e   :  { %378 = vmatpush1.bf16.msra.mxu1 %v545_v11  ;;  %v561_v22 = vld [vmem:[#allocation8 + $0x74] ss:$8 sps:$4 sm:$0xff]   ;;  %v563_v23 = vld [vmem:[#allocation8 + $0x70] ss:$8 sps:$4 sm:$0xff]   ;;  %v564_v24 = vld [vmem:[#allocation8 + $0x84] ss:$8 sps:$4 sm:$0xff]  }
  0x3f   :  { %379 = vmatprep.subr.bf16.mxu1 %v546_v12  ;;  %v566_v25 = vld [vmem:[#allocation8 + $0x80] ss:$8 sps:$4 sm:$0xff]   ;;  %v567_v26 = vld [vmem:[#allocation8 + $0x94] ss:$8 sps:$4 sm:$0xff]   ;;  %v569_v27 = vld [vmem:[#allocation8 + $0x90] ss:$8 sps:$4 sm:$0xff]  }
  0x40   :  { %492 = vmatmul.mubr.msk.bf16.vlgmr.msra.gmra.mrb[0].mxu0 %vm107_vm1, %v539_v10  ;;  %v570_v28 = vld [vmem:[#allocation8 + $0xa4] ss:$8 sps:$4 sm:$0xff]   ;;  %v572_v29 = vld [vmem:[#allocation8 + $0xa0] ss:$8 sps:$4 sm:$0xff]   ;;  %v573_v30 = vld [vmem:[#allocation8 + $0xb4] ss:$8 sps:$4 sm:$0xff]  }
  0x41   :  { %v575_v31 = vld [vmem:[#allocation8 + $0xb0] ss:$8 sps:$4 sm:$0xff]   ;;  %v576_v32 = vld [vmem:[#allocation8 + $0xc4] ss:$8 sps:$4 sm:$0xff]   ;;  %v578_v33 = vld [vmem:[#allocation8 + $0xc0] ss:$8 sps:$4 sm:$0xff]  }
  0x42   :  { %380 = vmatpush1.bf16.msra.mxu1 %v548_v13  ;;  %v579_v34 = vld [vmem:[#allocation8 + $0xd4] ss:$8 sps:$4 sm:$0xff]   ;;  %v581_v35 = vld [vmem:[#allocation8 + $0xd0] ss:$8 sps:$4 sm:$0xff]   ;;  %v582_v36 = vld [vmem:[#allocation8 + $0xe4] ss:$8 sps:$4 sm:$0xff]  }
  0x43   :  { %381 = vmatprep.subr.bf16.mxu1 %v549_v14  ;;  %v584_v37 = vld [vmem:[#allocation8 + $0xe0] ss:$8 sps:$4 sm:$0xff]   ;;  %v585_v38 = vld [vmem:[#allocation8 + $0xf4] ss:$8 sps:$4 sm:$0xff]   ;;  %v587_v39 = vld [vmem:[#allocation8 + $0xf0] ss:$8 sps:$4 sm:$0xff]  }
  0x44   :  { %v79_v42 = vsub.s32 0, %v773_v41  ;;  %v75_v43 = vld [vmem:[%s805_s2] sm:$0x3]  ;;  %v83_v44 = vsub.s32 1, %v773_v41  ;;  %s690_s20 = smov [#allocation9]   ;;  %vm465_vm2 = vcmask 130112  }
  0x45   :  { %v203_v1 = vld [vmem:[%s807_s4] sm:$0x3]  ;;  %s476_s21 = sshll.u32 %s690_s20, 4  ;;  %vm468_vm3 = vcmask 122880   ;;  %s477_s21 = int_to_ptr.vmem [resolvable:$true] %s476_s21 }
  0x46   :  { %382 = vmatpush1.bf16.msra.mxu1 %v551_v15  ;;  %v80_v45 = vrot.slane %v75_v43, %v79_v42  ;;  %v84_v46 = vrot.slane %v75_v43, %v83_v44  ;;  %v208_v2 = vrot.slane %v203_v1, %v79_v42  ;;  %v212_v3 = vrot.slane %v203_v1, %v83_v44  ;;  %v426_v5 = vld [vmem:[%s808_s5] sm:$0x3]  ;;  %s654_s22 = scalar_lea.vmem %s477_s21, 16  ;;  %p659_p11 = scmp.lt.s32.totalorder %s477_s21, %s477_s21 }
  0x47   :  { %383 = vmatprep.subr.bf16.mxu1 %v552_v16  ;;  %v431_v13 = vrot.slane %v426_v5, %v79_v42  ;;  %v435_v16 = vrot.slane %v426_v5, %v83_v44  ;;  %p655_p10 = scmp.ne.s32.totalorder %s477_s21, %s654_s22 }
  0x4a   :  { %384 = vmatpush1.bf16.msra.mxu1 %v554_v17 }
  0x4b   :  { %385 = vmatprep.subr.bf16.mxu1 %v555_v18 }
  0x4e   :  { %386 = vmatpush1.bf16.msra.mxu1 %v557_v19 }
  0x4f   :  { %387 = vmatprep.subr.bf16.mxu1 %v558_v20 }
  0x52   :  { %388 = vmatpush1.bf16.msra.mxu1 %v560_v21 }
  0x53   :  { %389 = vmatprep.subr.bf16.mxu1 %v561_v22 }
  0x56   :  { %390 = vmatpush1.bf16.msra.mxu1 %v563_v23 }
  0x57   :  { %391 = vmatprep.subr.bf16.mxu1 %v564_v24 }
  0x5a   :  { %392 = vmatpush1.bf16.msra.mxu1 %v566_v25 }
  0x5b   :  { %393 = vmatprep.subr.bf16.mxu1 %v567_v26 }
  0x5e   :  { %394 = vmatpush1.bf16.msra.mxu1 %v569_v27 }
  0x5f   :  { %395 = vmatprep.subr.bf16.mxu1 %v570_v28 }
  0x62   :  { %396 = vmatpush1.bf16.msra.mxu1 %v572_v29  ;;  %v455_v29 = vand.u32 127, %v77_v40 }
  0x63   :  { %397 = vmatprep.subr.bf16.mxu1 %v573_v30 }
  0x64   :  { %v460_v30 = vadd.s32 4294967288, %v455_v29 }
  0x66   :  { %398 = vmatpush1.bf16.msra.mxu1 %v575_v31  ;;  %v449_v31 = vstv %s809_s6  ;;  %s658_s6 = scalar_lea.vmem %s477_s21, 32 }
  0x67   :  { %399 = vmatprep.subr.bf16.mxu1 %v576_v32  ;;  %p660_p12 = scmp.lt.s32.totalorder %s658_s6, %s654_s22 }
  0x69   :  { %p661_p13 = por %p660_p12, %p659_p11 }
  0x6a   :  { %400 = vmatpush1.bf16.msra.mxu1 %v578_v33  ;;  %v458_v33 = vsub.s32 %v455_v29, %v773_v41 }
  0x6b   :  { %401 = vmatprep.subr.bf16.mxu1 %v579_v34  ;;  %p662_p0 = pnand %p661_p13, %p655_p10 }
  0x6e   :  { %402 = vmatpush1.bf16.msra.mxu1 %v581_v35  ;;  %v463_v35 = vsub.s32 %v460_v30, %v773_v41 }
  0x6f   :  { %403 = vmatprep.subr.bf16.mxu1 %v582_v36 }
  0x72   :  { %404 = vmatpush1.bf16.msra.mxu1 %v584_v37 }
  0x73   :  { %405 = vmatprep.subr.bf16.mxu1 %v585_v38 }
  0x76   :  { %406 = vmatpush1.bf16.msra.mxu1 %v587_v39 }
 0x113   :  { %v152_v47 = vpop.f32.mrb[0].mxu0 }
 0x114   :  { %v153_v48 = vadd.f32 %v152_v47, %v80_v45  ;;  %v154_v49 = vpop.f32.mrb[1].mxu0 }
 0x115   :  { %v155_v50 = vadd.f32 %v154_v49, %v84_v46  ;;  %v156_v51 = vpop.f32.mrb[2].mxu0 }
 0x116   :  { %v161_v52 = vmul.f32 0.2, %v153_v48  ;;  %v157_v53 = vadd.f32 %v156_v51, %v80_v45  ;;  %v158_v54 = vpop.f32.mrb[3].mxu0 }
 0x117   :  { %v162_v55 = vmul.f32 0.2, %v155_v50  ;;  %v159_v56 = vadd.f32 %v158_v54, %v84_v46 }
 0x118   :  { %v163_v57 = vmul.f32 0.2, %v157_v53  ;;  %v165_v59 = vmax.f32 %v153_v48, %v161_v52 }
 0x119   :  { %v164_v58 = vmul.f32 0.2, %v159_v56  ;;  %v166_v61 = vmax.f32 %v155_v50, %v162_v55 }
 0x11a   :  { %v167_v60 = vmax.f32 %v157_v53, %v163_v57 }
 0x11b   :  { %v168_v62 = vmax.f32 %v159_v56, %v164_v58 }
 0x11c   :  { %v169_v63 = vpack.c.bf16 %v167_v60, %v165_v59 }
 0x11d   :  { %v170_v0 = vpack.c.bf16 %v168_v62, %v166_v61 }
 0x11f   :  { %407 = vmatprep.mubr.bf16.mxu1 %v170_v0 }
 0x120   :  { %408 = vmatmul.mubr.bf16.vlgmr.msra.gmra.mrb[0].mxu1 %v169_v63 }
 0x1f3   :  { %v409_v4 = vpop.f32.mrb[0].mxu1 }
 0x1f4   :  { %v410_v6 = vadd.f32 %v409_v4, %v208_v2  ;;  %v411_v7 = vpop.f32.mrb[1].mxu1 }
 0x1f5   :  { %v412_v8 = vadd.f32 %v411_v7, %v212_v3  ;;  %v413_v9 = vpop.f32.mrb[2].mxu1 }
 0x1f6   :  { %v418_v10 = vmul.f32 0.2, %v410_v6  ;;  %v414_v11 = vadd.f32 %v413_v9, %v208_v2  ;;  %v415_v12 = vpop.f32.mrb[3].mxu1 }
 0x1f7   :  { %v419_v14 = vmul.f32 0.2, %v412_v8  ;;  %v416_v15 = vadd.f32 %v415_v12, %v212_v3 }
 0x1f8   :  { %v422_v17 = vmax.f32 %v410_v6, %v418_v10  ;;  %v420_v18 = vmul.f32 0.2, %v414_v11 }
 0x1f9   :  { %v423_v19 = vmax.f32 %v412_v8, %v419_v14  ;;  %v421_v20 = vmul.f32 0.2, %v416_v15 }
 0x1fa   :  { %v424_v21 = vmax.f32 %v414_v11, %v420_v18  ;;  %v438_v22 = vmul.f32 %v431_v13, %v422_v17 }
 0x1fb   :  { %v425_v23 = vmax.f32 %v416_v15, %v421_v20  ;;  %v439_v24 = vmul.f32 %v435_v16, %v423_v19 }
 0x1fc   :  { %v440_v25 = vmul.f32 %v431_v13, %v424_v21 }
 0x1fd   :  { %v442_v26 = vadd.f32 %v439_v24, %v438_v22  ;;  %v441_v27 = vmul.f32 %v435_v16, %v425_v23 }
 0x1ff   :  { %443 = vadd.xlane.f32.xlu0 %v442_v26  ;;  %v445_v28 = vadd.f32 %v441_v27, %v440_v25 }
 0x203   :  { %446 = vadd.xlane.f32.xlu0 %v445_v28 }
 0x28c   :  { %v444_v32 = vpop.xlane.xlu0 %443 }
 0x28d   :  { %v450_v34 = vadd.f32 %v449_v31, %v444_v32 }
 0x28f   :  { %v459_v38 = vrot.slane %v450_v34, %v458_v33 }
 0x290   :  { %v447_v36 = vpop.xlane.xlu0 %446 }
 0x291   :  { %v451_v37 = vadd.f32 %v449_v31, %v447_v36 }
 0x293   :  { %v464_v39 = vrot.slane %v451_v37, %v463_v35 }
 0x295   :  { %v466_v40 = vsel %vm465_vm2, %v464_v39, %v459_v38 }
 0x296   :  { %469 = vst.msk [vmem:[#allocation9] sm:$0x1] %vm468_vm3, %v466_v40 }
 0x297   :  { %665 = shalt.err (!%p662_p0)
}
 0x298   :  { %s666_s1 = scalar_lea.hbm %s810_s7, 16 }
 0x299   :  { %p667_p1 = scmp.ne.s32.totalorder %s810_s7, %s666_s1  ;;  %p670_p2 = scmp.lt.u32.totalorder %s666_s1, %s810_s7 }
 0x29b   :  { %p672_p3 = pnand %p670_p2, %p667_p1 }
 0x29d   :  { %675 = shalt.err (!%p672_p3)
}
 0x29e   :  { %479 = dma.vmem_to_hbm [thread:$0]  %s477_s21, 16, %s810_s7, [#allocation5]  }
 0x29f   :  { %680 = dma.done.wait [#allocation5], 16  }
 0x2a0   :  { %681 = vsyncadd [#allocation5], 4294967280 }
 0x2a1   :  { %483 = vsyncpa [#allocation4], 1 }
 0x2a2   :  { %484 = vsyncpa [#allocation7], 1 }
 0x2a3   :  { %485 = vsyncpa [#allocation5], 1 }

</bundles_post_ra>
